<compile_context>
chip_gen: v7x
topology: tpu7x:2x2x1
jax: 0.10.0
libtpu: 0.0.40
codegen_flags: <defaults>
</compile_context>

<pallas_src>
import jax
import jax.numpy as jnp
from jax.experimental import pallas as pl
from jax.experimental.pallas import tpu as pltpu


def _srelu_kernel(x_ref, o_ref):
    x = x_ref[...]
    # f(x) = relu(1 - x) * relu(x); weak-typed scalar constants broadcast
    # in-vreg and keep bf16/f16 inputs in their original dtype.
    o_ref[...] = jnp.maximum(1.0 - x, 0.0) * jnp.maximum(x, 0.0)


def _srelu_jnp(x):
    return jnp.maximum(1.0 - x, 0.0) * jnp.maximum(x, 0.0)


def _chip_params():
    """Generation-aware (target block bytes, TensorCores per chip)."""
    kind = ""
    try:
        kind = jax.devices()[0].device_kind.lower()
    except Exception:
        pass
    if "v6" in kind:
        # v6e: 1.4 TB/s HBM, 128 MiB VMEM -> bigger blocks amortize the
        # ~0.35 us per-grid-step overhead.
        return 6 * 1024 * 1024, 1
    if ("v7" in kind) or ("7x" in kind):
        # v7x: 3.2 TB/s HBM per TC, but only 64 MiB VMEM per TC and 2 TCs/chip.
        return 4 * 1024 * 1024, 2
    # v5e and older / unknown: stay well within the 16 MiB default scoped VMEM.
    return 2 * 1024 * 1024, 1


def srelu(x: jax.Array) -> jax.Array:
    """Applies f(x) = relu(1 - x) * relu(x) elementwise via a Pallas TPU kernel.

    Accepts any shape (e.g. NCHW); computes on a flattened, lane-dense 2-D view.
    Intended for floating-point dtypes (matches the PyTorch module).
    """
    orig_shape = x.shape
    orig_dtype = x.dtype
    n = x.size
    if n == 0:
        return x

    itemsize = jnp.dtype(orig_dtype).itemsize
    # dtype-aware sublane packing: 8 rows (f32), 16 (bf16/f16), 32 (int8/fp8).
    packing = 8 * max(1, 4 // itemsize)

    x_flat = x.reshape(-1)

    # 128-aligned prefix goes through the kernel; any (< 128 element) tail is
    # computed with plain jnp -- avoids padding the whole array (extra HBM pass).
    n_main = (n // 128) * 128
    if n_main == 0:
        # Entire input is tiny (< 128 elements): plain jnp is the right tool.
        return _srelu_jnp(x_flat).reshape(orig_shape)

    x_main = x_flat[:n_main] if n_main < n else x_flat

    # Widest lane-dense last dim dividing the aligned prefix; prefer one that
    # still leaves >= `packing` rows so sublanes are filled.
    div_cands = [w for w in (16384, 8192, 4096, 2048, 1024, 512, 256, 128)
                 if n_main % w == 0]
    good = [w for w in div_cands if n_main // w >= packing]
    W = good[0] if good else div_cands[-1]
    rows = n_main // W
    x2d = x_main.reshape(rows, W)

    target_bytes, num_tc = _chip_params()

    # Base row tile from the per-generation byte budget.
    tr = max(packing, (target_bytes // (W * itemsize)) // packing * packing)
    tr = min(tr, rows)  # full-extent block is always legal

    # Keep enough grid steps: >= 8 on 2-TC chips (cross-core sharding of the
    # "parallel" axis), >= 2 on 1-TC chips (DMA pipelining across steps).
    min_blocks = 8 if num_tc >= 2 else 2
    if rows >= min_blocks * packing:
        cap = max(packing, (rows // min_blocks) // packing * packing)
        tr = min(tr, cap)

    grid = (pl.cdiv(rows, tr),)  # partial boundary block is fine (elementwise)

    tile_bytes = tr * W * itemsize
    # ~25% headroom over the 4 double-buffered (in + out) tiles, capped so it
    # stays inside every generation's physical VMEM (64 MiB/TC on v7x).
    vmem_limit = min(int(4 * tile_bytes * 1.25) + (1 << 20), 64 * 1024 * 1024)

    out2d = pl.pallas_call(
        _srelu_kernel,
        out_shape=jax.ShapeDtypeStruct((rows, W), orig_dtype),
        grid_spec=pltpu.PrefetchScalarGridSpec(
            num_scalar_prefetch=0,
            grid=grid,
            in_specs=[pl.BlockSpec((tr, W), lambda i: (i, 0))],
            out_specs=pl.BlockSpec((tr, W), lambda i: (i, 0)),
        ),
        compiler_params=pltpu.CompilerParams(
            dimension_semantics=("parallel",),  # shards across TCs on v7x
            vmem_limit_bytes=vmem_limit,
        ),
        cost_estimate=pl.CostEstimate(
            flops=4 * n_main,
            transcendentals=0,
            bytes_accessed=2 * n_main * itemsize,
        ),
    )(x2d)

    out_flat = out2d.reshape(-1)
    if n_main < n:
        out_tail = _srelu_jnp(x_flat[n_main:])
        out_flat = jnp.concatenate([out_flat, out_tail])
    return out_flat.reshape(orig_shape)


if __name__ == "__main__":
    key = jax.random.PRNGKey(0)
    k0, k1 = jax.random.split(key)

    # NCHW activation-style input (128-aligned fast path).
    x = jax.random.normal(k0, (2, 4, 16, 16), dtype=jnp.float32)
    out = jax.block_until_ready(srelu(x))
    ref = _srelu_jnp(x)
    assert out.shape == x.shape and out.dtype == x.dtype
    assert jnp.allclose(out, ref, atol=1e-6, rtol=1e-6), "mismatch (aligned)"

    # Misaligned size: exercises the aligned-prefix kernel + jnp tail path.
    x2 = jax.random.normal(k1, (3, 5, 7, 5), dtype=jnp.float32)
    out2 = jax.block_until_ready(srelu(x2))
    ref2 = _srelu_jnp(x2)
    assert out2.shape == x2.shape and out2.dtype == x2.dtype
    assert jnp.allclose(out2, ref2, atol=1e-6, rtol=1e-6), "mismatch (misaligned)"

    print("KERNEL_OK")
</pallas_src>

<mosaic_0001>
module attributes {stable_mosaic.version = 11 : i64} {
  func.func @_srelu_kernel(%arg0: i32, %arg1: memref<8x256xf32, #tpu.memory_space<vmem>>, %arg2: memref<8x256xf32, #tpu.memory_space<vmem>>) attributes {dimension_semantics = [#tpu.dimension_semantics<parallel>], iteration_bounds = array<i64: 1>, scalar_prefetch = 0 : i64, scratch_operands = 0 : i64, tpu.core_type = #tpu.core_type<tc>, window_params = [{transform_indices = @transform_0, window_bounds = array<i64: 8, 256>}, {transform_indices = @transform_1, window_bounds = array<i64: 8, 256>}]} {
    %c0 = arith.constant 0 : index
    %c0_0 = arith.constant 0 : index
    %0 = vector.load %arg1[%c0, %c0_0] : memref<8x256xf32, #tpu.memory_space<vmem>>, vector<8x256xf32>
    %cst = arith.constant 1.000000e+00 : f32
    %1 = vector.broadcast %cst : f32 to vector<8x256xf32>
    %2 = arith.subf %1, %0 : vector<8x256xf32>
    %cst_1 = arith.constant 0.000000e+00 : f32
    %3 = vector.broadcast %cst_1 : f32 to vector<8x256xf32>
    %4 = arith.maximumf %2, %3 : vector<8x256xf32>
    %cst_2 = arith.constant 0.000000e+00 : f32
    %5 = vector.broadcast %cst_2 : f32 to vector<8x256xf32>
    %6 = arith.maximumf %0, %5 : vector<8x256xf32>
    %7 = arith.mulf %4, %6 : vector<8x256xf32>
    %c0_3 = arith.constant 0 : index
    %c0_4 = arith.constant 0 : index
    %8 = vector.load %arg2[%c0_3, %c0_4] : memref<8x256xf32, #tpu.memory_space<vmem>>, vector<8x256xf32>
    tpu.vector_store %arg2[%c0_3, %c0_4], %7 {strides = array<i32>} : memref<8x256xf32, #tpu.memory_space<vmem>>, vector<8x256xf32>,
    return
  }
  func.func @transform_0(%arg0: i32) -> (i32, i32) {
    %c0_i32 = arith.constant 0 : i32
    %c0_i32_0 = arith.constant 0 : i32
    return %arg0, %c0_i32 : i32, i32
  }
  func.func @transform_1(%arg0: i32) -> (i32, i32) {
    %c0_i32 = arith.constant 0 : i32
    %c0_i32_0 = arith.constant 0 : i32
    return %arg0, %c0_i32 : i32, i32
  }
}

</mosaic_0001>

<bundles_post_ra>
// kernel: tpu_custom_call.1
= control target key start
LH: loop header
LB: loop body
LE: loop exit
PB: predicated region body
PF: predicated region fallthrough
CT: control target
= control target key end

     0   :  { %6 = vsyncpa [#allocation3], 0  ;;  %s134_s0 = inlined_call_operand.hbm [shape: f32[8,256], index: 0, kind: input, shape index: {}]   ;;  %s135_s1 = inlined_call_operand.hbm [shape: f32[8,256], index: 1, kind: output, shape index: {}]  }
   0x1   :  { %7 = vsyncpa [#allocation4], 0  ;;  %s98_s6 = smov [#allocation2]   ;;  %s50_s10 = scalar_lea.hbm %s134_s0, 256 }
   0x2   :  { %s14_s7 = sshll.u32 %s98_s6, 4  ;;  %p51_p0 = scmp.ne.s32.totalorder %s134_s0, %s50_s10  ;;  %s15_s7 = int_to_ptr.vmem [resolvable:$true] %s14_s7 }
   0x3   :  { %p54_p1 = scmp.lt.u32.totalorder %s50_s10, %s134_s0 }
   0x5   :  { %p56_p2 = pnand %p54_p1, %p51_p0 }
   0x7   :  { %59 = shalt.err (!%p56_p2)
}
   0x8   :  { %s60_s15 = scalar_lea.vmem %s15_s7, 256  ;;  %p65_p4 = scmp.lt.s32.totalorder %s15_s7, %s15_s7 }
   0x9   :  { %p61_p3 = scmp.ne.s32.totalorder %s15_s7, %s60_s15  ;;  %p66_p5 = scmp.lt.s32.totalorder %s60_s15, %s60_s15 }
   0xb   :  { %p67_p6 = por %p66_p5, %p65_p4 }
   0xd   :  { %p68_p7 = pnand %p67_p6, %p61_p3 }
   0xf   :  { %71 = shalt.err (!%p68_p7)
}
  0x10   :  { %17 = dma.hbm_to_vmem [thread:$0]  %s134_s0, 256, %s15_s7, [#allocation3]  }
  0x11   :  { %94 = dma.done.wait [#allocation3], 256  }
  0x12   :  { %95 = vsyncadd [#allocation3], 4294967040  ;;  %v21_v0 = vld [vmem:[#allocation2] sm:$0xff]  ;;  %v22_v1 = vld [vmem:[#allocation2 + $0x8] sm:$0xff]  ;;  %s99_s18 = smov [#allocation5]  }
  0x13   :  { %v23_v2 = vsub.f32 1.0, %v21_v0  ;;  %v27_v3 = vmax.f32 %v21_v0, 0.0  ;;  %v24_v4 = vsub.f32 1.0, %v22_v1  ;;  %v28_v5 = vmax.f32 %v22_v1, 0.0  ;;  %s39_s19 = sshll.u32 %s99_s18, 4  ;;  %s40_s19 = int_to_ptr.vmem [resolvable:$true] %s39_s19 }
  0x14   :  { %s72_s20 = scalar_lea.vmem %s40_s19, 256  ;;  %p77_p9 = scmp.lt.s32.totalorder %s40_s19, %s40_s19 }
  0x15   :  { %v25_v6 = vmax.f32 %v23_v2, 0.0  ;;  %v26_v7 = vmax.f32 %v24_v4, 0.0  ;;  %p73_p8 = scmp.ne.s32.totalorder %s40_s19, %s72_s20  ;;  %p78_p10 = scmp.lt.s32.totalorder %s72_s20, %s72_s20 }
  0x17   :  { %v29_v8 = vmul.f32 %v27_v3, %v25_v6  ;;  %v30_v9 = vmul.f32 %v28_v5, %v26_v7  ;;  %p79_p11 = por %p78_p10, %p77_p9 }
  0x19   :  { %31 = vst [vmem:[#allocation5] sm:$0xff] %v29_v8  ;;  %32 = vst [vmem:[#allocation5 + $0x8] sm:$0xff] %v30_v9  ;;  %p80_p12 = pnand %p79_p11, %p73_p8 }
  0x1b   :  { %83 = shalt.err (!%p80_p12)
}
  0x1c   :  { %s84_s22 = scalar_lea.hbm %s135_s1, 256 }
  0x1d   :  { %p85_p13 = scmp.ne.s32.totalorder %s135_s1, %s84_s22  ;;  %p88_p0 = scmp.lt.u32.totalorder %s84_s22, %s135_s1 }
  0x1f   :  { %p90_p1 = pnand %p88_p0, %p85_p13 }
  0x21   :  { %93 = shalt.err (!%p90_p1)
}
  0x22   :  { %42 = dma.vmem_to_hbm [thread:$0]  %s40_s19, 256, %s135_s1, [#allocation4]  }
  0x23   :  { %96 = dma.done.wait [#allocation4], 256  }
  0x24   :  { %97 = vsyncadd [#allocation4], 4294967040 }
  0x25   :  { %46 = vsyncpa [#allocation3], 1 }
  0x26   :  { %47 = vsyncpa [#allocation4], 1 }

</bundles_post_ra>
